<compile_context>
chip_gen: v6e
topology: v6e:2x2x1
jax: 0.10.0
libtpu: 0.0.40
codegen_flags: <defaults>
</compile_context>

<pallas_src>
import functools
import math

import jax
import jax.numpy as jnp
from jax import lax
from jax.experimental import pallas as pl
from jax.experimental.pallas import tpu as pltpu


def _attn_group_kernel(x_ref, w_ref, o_ref, *, emb, group, batch_tile,
                       bf16_exp):
    # x_ref : (B_TILE, t, e)     bf16/f32  tokens for B_TILE batch elements
    # w_ref : (1, e, 3*G*e)      bf16      fused [Q | K | V] weights in (in, out)
    #                                      layout; 1/sqrt(e) folded into Q.
    # o_ref : (B_TILE, t, G*e)   out dtype output slab, final (b, t, h*e) layout
    e = emb
    g_heads = group
    bt = batch_tile
    ge = g_heads * e
    t = x_ref.shape[1]

    x = x_ref[...].astype(jnp.bfloat16).reshape(bt * t, e)    # (bt*t, e)
    w = w_ref[0]                                              # (e, 3*G*e) bf16

    # Fused QKV projection for all G heads of all bt batch elements:
    # one MXU matmul with M = bt*t, N = 3*G*e (lane dense), f32 accumulate.
    qkv = lax.dot_general(
        x, w,
        dimension_numbers=(((1,), (0,)), ((), ())),
        preferred_element_type=jnp.float32)                   # (bt*t, 3*G*e)
    qkv = qkv.astype(jnp.bfloat16)                            # cast ONCE

    for bi in range(bt):                                      # static unroll
        r0 = bi * t
        head_outs = []
        for g in range(g_heads):                              # static unroll
            c0 = g * e
            q = qkv[r0:r0 + t, c0:c0 + e]                     # (t, e) bf16 (pre-scaled)
            k = qkv[r0:r0 + t, ge + c0:ge + c0 + e]           # (t, e) bf16
            v = qkv[r0:r0 + t, 2 * ge + c0:2 * ge + c0 + e]   # (t, e) bf16

            # scores (t, t): contract the e axes directly (q . k^T on the MXU).
            s = lax.dot_general(
                q, k,
                dimension_numbers=(((1,), (1,)), ((), ())),
                preferred_element_type=jnp.float32)

            m = jnp.max(s, axis=-1, keepdims=True)            # f32 (XLU)
            if bf16_exp:
                # v6e/v7x: bf16 EUP ~2x exp throughput; sums stay f32.
                p = jnp.exp((s - m).astype(jnp.bfloat16))
                denom = jnp.sum(p.astype(jnp.float32), axis=-1, keepdims=True)
                pv = jnp.dot(p, v, preferred_element_type=jnp.float32)
            else:
                # v5e has no bf16 EUP/VPU: keep exp in f32.
                p = jnp.exp(s - m)
                denom = jnp.sum(p, axis=-1, keepdims=True)
                pv = jnp.dot(p.astype(jnp.bfloat16), v,
                             preferred_element_type=jnp.float32)

            # Normalize AFTER the PV matmul: t*e multiplies instead of t*t,
            # reciprocal stays on the EUP slot.
            head_outs.append(pv * pl.reciprocal(denom, approx=True))

        # One full-lane-width (G*e multiple of 128, or full row) unmasked
        # store per batch element -- no width-e masked partial stores.
        o_ref[bi, :, :] = jnp.concatenate(head_outs, axis=-1).astype(o_ref.dtype)


def _pick_group(heads, emb):
    """Smallest divisor G of `heads` whose output slab G*emb is a multiple of
    128 lanes (lane-dense stores & weight blocks); otherwise fall back to all
    heads (block spans the full last dim -> still a legal BlockSpec, but the
    stores become masked partial-lane writes: known perf cliff)."""
    for g in range(1, heads + 1):
        if heads % g == 0 and (g * emb) % 128 == 0:
            return g
    return heads


def _pick_batch_tile(b, t, g_heads):
    """Batch elements per grid step.  Raises the fused-QKV matmul M toward the
    MXU-native row count and amortizes per-step overhead, bounded so the
    static (B_TILE x G) unroll and the VMEM intermediates stay small."""
    if b <= 1 or t % 8 != 0:        # need a sublane-aligned (B_TILE, t) merge
        return 1
    bt = max(1, min(b, 256 // t, 8, 32 // max(g_heads, 1)))
    while bt > 1 and b % bt != 0:
        bt -= 1
    return max(bt, 1)


def _has_bf16_eup():
    """v6e / v7x have a bf16 EUP & VPU; v5e and older do not."""
    try:
        kind = jax.devices()[0].device_kind.lower()
    except Exception:
        return False
    if "tpu" not in kind:
        return False
    for old in ("v2", "v3", "v4", "v5"):
        if old in kind:
            return False
    return True


def _vmem_budget_bytes():
    """Physical VMEM per core with ~20% headroom for compiler-internal scratch:
    ~51 MiB on v7x (64 MiB physical), ~102 MiB on v5e/v6e (128 MiB)."""
    cap = 64 << 20
    try:
        cap = int(getattr(pltpu.get_tpu_info(), "vmem_capacity_bytes", cap))
    except Exception:
        pass
    return int(cap * 0.8)


def _rup(v, m):
    return ((v + m - 1) // m) * m


def self_attention_wide(x, w_keys, w_queries, w_values, heads):
    """x: (b, t, e) float32.  w_*: (e*heads, e) nn.Linear-style weights (no bias).

    Returns (b, t, heads*e), matching SelfAttentionWide.forward (mask=False).
    """
    b, t, e = x.shape
    h = heads
    assert w_keys.shape == (e * h, e)
    assert w_queries.shape == (e * h, e)
    assert w_values.shape == (e * h, e)

    out_dtype = x.dtype
    g_heads = _pick_group(h, e)
    n_g = h // g_heads
    ge = g_heads * e
    bt = _pick_batch_tile(b, t, g_heads)
    n_bt = b // bt

    # Fused per-group weights in (in, out) orientation: (n_g, e, 3*G*e).
    # Lane-dense last dim, natural MXU (K, N) operand, and the attention scale
    # 1/sqrt(e) (= e**-0.25 applied to both q and k) folded into Q's weights.
    def group_w(w, scale=1.0):
        wt = (w * scale).T.reshape(e, n_g, ge)       # (e, n_g, G*e)
        return jnp.transpose(wt, (1, 0, 2))          # (n_g, e, G*e)

    q_scale = 1.0 / math.sqrt(e)
    w_all = jnp.concatenate(
        [group_w(w_queries, q_scale), group_w(w_keys), group_w(w_values)],
        axis=2).astype(jnp.bfloat16)                 # (n_g, e, 3*G*e)

    # Grid ordering by residency: the operand whose block index depends only
    # on the OUTER grid axis stays resident across the inner axis (no re-DMA).
    w_block_bytes = e * 3 * ge * 2                   # bf16 fused weight block
    x_block_bytes = bt * t * e * 2                   # bf16 activation block
    weights_outer = w_block_bytes > x_block_bytes

    # x is re-fetched once per head group when the weights are resident:
    # pre-cast it to bf16 so every re-fetch moves half the bytes.
    precast = weights_outer and n_g >= 2
    x_in = x.astype(jnp.bfloat16) if precast else x

    if weights_outer:
        grid = (n_g, n_bt)
        x_map = lambda gi, bi: (bi, 0, 0)
        w_map = lambda gi, bi: (gi, 0, 0)
        o_map = lambda gi, bi: (bi, 0, gi)
    else:
        grid = (n_bt, n_g)
        x_map = lambda bi, gi: (bi, 0, 0)
        w_map = lambda bi, gi: (gi, 0, 0)
        o_map = lambda bi, gi: (bi, 0, gi)

    # VMEM accounting: lane/sublane padding + double-buffered BlockSpec blocks
    # + the dominant in-kernel intermediates (qkv f32+bf16, (t,t) scores,
    # per-head padded slices, concatenated head-group output).
    xb = 2 * bt * _rup(t, 8) * _rup(e, 128) * x_in.dtype.itemsize
    wb = 2 * _rup(e, 8) * _rup(3 * ge, 128) * 2
    ob = 2 * bt * _rup(t, 8) * _rup(ge, 128) * jnp.dtype(out_dtype).itemsize
    qkv_b = _rup(bt * t, 8) * _rup(3 * ge, 128) * (4 + 2)
    score_b = 4 * _rup(t, 8) * _rup(t, 128) * 4
    slices_b = (4 + g_heads) * _rup(t, 8) * _rup(e, 128) * 4
    concat_b = _rup(t, 8) * _rup(ge, 128) * 4
    needed = int(1.5 * (xb + wb + ob + qkv_b + score_b + slices_b + concat_b))
    vmem_limit = int(min(_vmem_budget_bytes(), max(needed, 32 << 20)))

    bf16_exp = _has_bf16_eup()
    kernel = functools.partial(_attn_group_kernel, emb=e, group=g_heads,
                               batch_tile=bt, bf16_exp=bf16_exp)

    cost = pl.CostEstimate(
        flops=int(2 * b * t * e * 3 * h * e + 4 * b * h * t * t * e),
        transcendentals=int(b * h * t * t),
        bytes_accessed=int(
            x_in.size * x_in.dtype.itemsize * (n_g if weights_outer else 1)
            + w_all.size * 2 * (1 if weights_outer else n_bt)
            + b * t * h * e * jnp.dtype(out_dtype).itemsize))

    out = pl.pallas_call(
        kernel,
        out_shape=jax.ShapeDtypeStruct((b, t, h * e), out_dtype),
        grid_spec=pltpu.PrefetchScalarGridSpec(
            num_scalar_prefetch=0,
            grid=grid,
            in_specs=[
                pl.BlockSpec((bt, t, e), x_map),           # activations
                pl.BlockSpec((1, e, 3 * ge), w_map),       # fused QKV weights
            ],
            out_specs=pl.BlockSpec((bt, t, ge), o_map),    # lane-dense slab
        ),
        compiler_params=pltpu.CompilerParams(
            dimension_semantics=("parallel", "parallel"),
            vmem_limit_bytes=vmem_limit),
        cost_estimate=cost,
    )(x_in, w_all)
    return out


def _reference(x, w_keys, w_queries, w_values, heads):
    """Pure-JAX f32 reference mirroring the PyTorch forward, for verification."""
    b, t, e = x.shape
    h = heads
    keys = (x @ w_keys.T).reshape(b, t, h, e)
    queries = (x @ w_queries.T).reshape(b, t, h, e)
    values = (x @ w_values.T).reshape(b, t, h, e)
    keys = jnp.transpose(keys, (0, 2, 1, 3)).reshape(b * h, t, e)
    queries = jnp.transpose(queries, (0, 2, 1, 3)).reshape(b * h, t, e)
    values = jnp.transpose(values, (0, 2, 1, 3)).reshape(b * h, t, e)
    queries = queries / e ** 0.25
    keys = keys / e ** 0.25
    dot = jnp.einsum("bqe,bke->bqk", queries, keys)
    dot = jax.nn.softmax(dot, axis=2)
    out = jnp.einsum("bqk,bke->bqe", dot, values).reshape(b, h, t, e)
    return jnp.transpose(out, (0, 2, 1, 3)).reshape(b, t, h * e)


if __name__ == "__main__":
    # Small shapes consistent with the module's forward: (batch, tokens, emb)
    b, t, e, heads = 2, 8, 32, 8

    key = jax.random.PRNGKey(0)
    kx, kk, kq, kv = jax.random.split(key, 4)

    x = jax.random.normal(kx, (b, t, e), dtype=jnp.float32)
    # nn.Linear(emb, emb*heads, bias=False) weights: shape (emb*heads, emb)
    w_keys = jax.random.normal(kk, (e * heads, e), dtype=jnp.float32) * 0.05
    w_queries = jax.random.normal(kq, (e * heads, e), dtype=jnp.float32) * 0.05
    w_values = jax.random.normal(kv, (e * heads, e), dtype=jnp.float32) * 0.05

    out = self_attention_wide(x, w_keys, w_queries, w_values, heads)
    out = jax.block_until_ready(out)

    ref = _reference(x, w_keys, w_queries, w_values, heads)
    assert out.shape == (b, t, heads * e), out.shape
    max_err = float(jnp.max(jnp.abs(out - ref)))
    # bf16 MXU operands, approx reciprocal, and (on v6e/v7x) bf16 exp =>
    # compare against the f32 reference with a bf16-appropriate tolerance.
    assert max_err < 3e-2, f"mismatch vs reference, max abs err = {max_err}"

    print("KERNEL_OK")
</pallas_src>

<mosaic_0001>
module attributes {stable_mosaic.version = 11 : i64} {
  func.func @_attn_group_kernel(%arg0: i32, %arg1: i32, %arg2: memref<2x8x32xbf16, #tpu.memory_space<vmem>>, %arg3: memref<1x32x384xbf16, #tpu.memory_space<vmem>>, %arg4: memref<2x8x128xf32, #tpu.memory_space<vmem>>) attributes {dimension_semantics = [#tpu.dimension_semantics<parallel>, #tpu.dimension_semantics<parallel>], iteration_bounds = array<i64: 2, 1>, scalar_prefetch = 0 : i64, scratch_operands = 0 : i64, tpu.core_type = #tpu.core_type<tc>, window_params = [{transform_indices = @transform_0, window_bounds = array<i64: 2, 8, 32>}, {transform_indices = @transform_1, window_bounds = array<i64: 1, 32, 384>}, {transform_indices = @transform_2, window_bounds = array<i64: 2, 8, 128>}]} {
    %c0 = arith.constant 0 : index
    %c0_0 = arith.constant 0 : index
    %c0_1 = arith.constant 0 : index
    %0 = vector.load %arg2[%c0, %c0_0, %c0_1] : memref<2x8x32xbf16, #tpu.memory_space<vmem>>, vector<2x8x32xbf16>
    %1 = vector.shape_cast %0 : vector<2x8x32xbf16> to vector<16x32xbf16>
    %c0_2 = arith.constant 0 : index
    %c0_3 = arith.constant 0 : index
    %c0_4 = arith.constant 0 : index
    %2 = vector.load %arg3[%c0_2, %c0_3, %c0_4] : memref<1x32x384xbf16, #tpu.memory_space<vmem>>, vector<1x32x384xbf16>
    %3 = vector.shape_cast %2 : vector<1x32x384xbf16> to vector<32x384xbf16>
    %cst = arith.constant dense<0.000000e+00> : vector<16x384xf32>
    %4 = tpu.matmul %1, %3, %cst {dimension_numbers = #tpu.dot_dimension_numbers<[1], [0], [0], [1], [0, 0, 1, 1], [], []>} : vector<16x32xbf16>, vector<32x384xbf16>, vector<16x384xf32> -> vector<16x384xf32>
    %5 = arith.truncf %4 : vector<16x384xf32> to vector<16x384xbf16>
    %6 = vector.extract_strided_slice %5 {offsets = [0, 0], sizes = [8, 32], strides = [1, 1]} : vector<16x384xbf16> to vector<8x32xbf16>
    %7 = vector.extract_strided_slice %5 {offsets = [0, 128], sizes = [8, 32], strides = [1, 1]} : vector<16x384xbf16> to vector<8x32xbf16>
    %8 = vector.extract_strided_slice %5 {offsets = [0, 256], sizes = [8, 32], strides = [1, 1]} : vector<16x384xbf16> to vector<8x32xbf16>
    %cst_5 = arith.constant dense<0.000000e+00> : vector<8x8xf32>
    %9 = tpu.matmul %6, %7, %cst_5 {dimension_numbers = #tpu.dot_dimension_numbers<[1], [1], [0], [0], [0, 0, 1, 0], [], []>} : vector<8x32xbf16>, vector<8x32xbf16>, vector<8x8xf32> -> vector<8x8xf32>
    %cst_6 = arith.constant dense<0xFF800000> : vector<8xf32>
    %10 = vector.multi_reduction <maximumf>, %9, %cst_6 [1] : vector<8x8xf32> to vector<8xf32>
    %11 = vector.shape_cast %10 : vector<8xf32> to vector<8x1xf32>
    %12 = vector.broadcast %11 : vector<8x1xf32> to vector<8x8xf32>
    %13 = arith.subf %9, %12 : vector<8x8xf32>
    %14 = math.exp %13 : vector<8x8xf32>
    %cst_7 = arith.constant dense<0.000000e+00> : vector<8xf32>
    %15 = vector.multi_reduction <add>, %14, %cst_7 [1] : vector<8x8xf32> to vector<8xf32>
    %16 = vector.shape_cast %15 : vector<8xf32> to vector<8x1xf32>
    %17 = arith.truncf %14 : vector<8x8xf32> to vector<8x8xbf16>
    %cst_8 = arith.constant dense<0.000000e+00> : vector<8x32xf32>
    %18 = tpu.matmul %17, %8, %cst_8 {dimension_numbers = #tpu.dot_dimension_numbers<[1], [0], [0], [1], [0, 0, 1, 1], [], []>} : vector<8x8xbf16>, vector<8x32xbf16>, vector<8x32xf32> -> vector<8x32xf32>
    %19 = tpu.reciprocal %16 {approx = true} : vector<8x1xf32> -> vector<8x1xf32>
    %20 = vector.broadcast %19 : vector<8x1xf32> to vector<8x32xf32>
    %21 = arith.mulf %18, %20 : vector<8x32xf32>
    %22 = vector.extract_strided_slice %5 {offsets = [0, 32], sizes = [8, 32], strides = [1, 1]} : vector<16x384xbf16> to vector<8x32xbf16>
    %23 = vector.extract_strided_slice %5 {offsets = [0, 160], sizes = [8, 32], strides = [1, 1]} : vector<16x384xbf16> to vector<8x32xbf16>
    %24 = vector.extract_strided_slice %5 {offsets = [0, 288], sizes = [8, 32], strides = [1, 1]} : vector<16x384xbf16> to vector<8x32xbf16>
    %cst_9 = arith.constant dense<0.000000e+00> : vector<8x8xf32>
    %25 = tpu.matmul %22, %23, %cst_9 {dimension_numbers = #tpu.dot_dimension_numbers<[1], [1], [0], [0], [0, 0, 1, 0], [], []>} : vector<8x32xbf16>, vector<8x32xbf16>, vector<8x8xf32> -> vector<8x8xf32>
    %cst_10 = arith.constant dense<0xFF800000> : vector<8xf32>
    %26 = vector.multi_reduction <maximumf>, %25, %cst_10 [1] : vector<8x8xf32> to vector<8xf32>
    %27 = vector.shape_cast %26 : vector<8xf32> to vector<8x1xf32>
    %28 = vector.broadcast %27 : vector<8x1xf32> to vector<8x8xf32>
    %29 = arith.subf %25, %28 : vector<8x8xf32>
    %30 = math.exp %29 : vector<8x8xf32>
    %cst_11 = arith.constant dense<0.000000e+00> : vector<8xf32>
    %31 = vector.multi_reduction <add>, %30, %cst_11 [1] : vector<8x8xf32> to vector<8xf32>
    %32 = vector.shape_cast %31 : vector<8xf32> to vector<8x1xf32>
    %33 = arith.truncf %30 : vector<8x8xf32> to vector<8x8xbf16>
    %cst_12 = arith.constant dense<0.000000e+00> : vector<8x32xf32>
    %34 = tpu.matmul %33, %24, %cst_12 {dimension_numbers = #tpu.dot_dimension_numbers<[1], [0], [0], [1], [0, 0, 1, 1], [], []>} : vector<8x8xbf16>, vector<8x32xbf16>, vector<8x32xf32> -> vector<8x32xf32>
    %35 = tpu.reciprocal %32 {approx = true} : vector<8x1xf32> -> vector<8x1xf32>
    %36 = vector.broadcast %35 : vector<8x1xf32> to vector<8x32xf32>
    %37 = arith.mulf %34, %36 : vector<8x32xf32>
    %38 = vector.extract_strided_slice %5 {offsets = [0, 64], sizes = [8, 32], strides = [1, 1]} : vector<16x384xbf16> to vector<8x32xbf16>
    %39 = vector.extract_strided_slice %5 {offsets = [0, 192], sizes = [8, 32], strides = [1, 1]} : vector<16x384xbf16> to vector<8x32xbf16>
    %40 = vector.extract_strided_slice %5 {offsets = [0, 320], sizes = [8, 32], strides = [1, 1]} : vector<16x384xbf16> to vector<8x32xbf16>
    %cst_13 = arith.constant dense<0.000000e+00> : vector<8x8xf32>
    %41 = tpu.matmul %38, %39, %cst_13 {dimension_numbers = #tpu.dot_dimension_numbers<[1], [1], [0], [0], [0, 0, 1, 0], [], []>} : vector<8x32xbf16>, vector<8x32xbf16>, vector<8x8xf32> -> vector<8x8xf32>
    %cst_14 = arith.constant dense<0xFF800000> : vector<8xf32>
    %42 = vector.multi_reduction <maximumf>, %41, %cst_14 [1] : vector<8x8xf32> to vector<8xf32>
    %43 = vector.shape_cast %42 : vector<8xf32> to vector<8x1xf32>
    %44 = vector.broadcast %43 : vector<8x1xf32> to vector<8x8xf32>
    %45 = arith.subf %41, %44 : vector<8x8xf32>
    %46 = math.exp %45 : vector<8x8xf32>
    %cst_15 = arith.constant dense<0.000000e+00> : vector<8xf32>
    %47 = vector.multi_reduction <add>, %46, %cst_15 [1] : vector<8x8xf32> to vector<8xf32>
    %48 = vector.shape_cast %47 : vector<8xf32> to vector<8x1xf32>
    %49 = arith.truncf %46 : vector<8x8xf32> to vector<8x8xbf16>
    %cst_16 = arith.constant dense<0.000000e+00> : vector<8x32xf32>
    %50 = tpu.matmul %49, %40, %cst_16 {dimension_numbers = #tpu.dot_dimension_numbers<[1], [0], [0], [1], [0, 0, 1, 1], [], []>} : vector<8x8xbf16>, vector<8x32xbf16>, vector<8x32xf32> -> vector<8x32xf32>
    %51 = tpu.reciprocal %48 {approx = true} : vector<8x1xf32> -> vector<8x1xf32>
    %52 = vector.broadcast %51 : vector<8x1xf32> to vector<8x32xf32>
    %53 = arith.mulf %50, %52 : vector<8x32xf32>
    %54 = vector.extract_strided_slice %5 {offsets = [0, 96], sizes = [8, 32], strides = [1, 1]} : vector<16x384xbf16> to vector<8x32xbf16>
    %55 = vector.extract_strided_slice %5 {offsets = [0, 224], sizes = [8, 32], strides = [1, 1]} : vector<16x384xbf16> to vector<8x32xbf16>
    %56 = vector.extract_strided_slice %5 {offsets = [0, 352], sizes = [8, 32], strides = [1, 1]} : vector<16x384xbf16> to vector<8x32xbf16>
    %cst_17 = arith.constant dense<0.000000e+00> : vector<8x8xf32>
    %57 = tpu.matmul %54, %55, %cst_17 {dimension_numbers = #tpu.dot_dimension_numbers<[1], [1], [0], [0], [0, 0, 1, 0], [], []>} : vector<8x32xbf16>, vector<8x32xbf16>, vector<8x8xf32> -> vector<8x8xf32>
    %cst_18 = arith.constant dense<0xFF800000> : vector<8xf32>
    %58 = vector.multi_reduction <maximumf>, %57, %cst_18 [1] : vector<8x8xf32> to vector<8xf32>
    %59 = vector.shape_cast %58 : vector<8xf32> to vector<8x1xf32>
    %60 = vector.broadcast %59 : vector<8x1xf32> to vector<8x8xf32>
    %61 = arith.subf %57, %60 : vector<8x8xf32>
    %62 = math.exp %61 : vector<8x8xf32>
    %cst_19 = arith.constant dense<0.000000e+00> : vector<8xf32>
    %63 = vector.multi_reduction <add>, %62, %cst_19 [1] : vector<8x8xf32> to vector<8xf32>
    %64 = vector.shape_cast %63 : vector<8xf32> to vector<8x1xf32>
    %65 = arith.truncf %62 : vector<8x8xf32> to vector<8x8xbf16>
    %cst_20 = arith.constant dense<0.000000e+00> : vector<8x32xf32>
    %66 = tpu.matmul %65, %56, %cst_20 {dimension_numbers = #tpu.dot_dimension_numbers<[1], [0], [0], [1], [0, 0, 1, 1], [], []>} : vector<8x8xbf16>, vector<8x32xbf16>, vector<8x32xf32> -> vector<8x32xf32>
    %67 = tpu.reciprocal %64 {approx = true} : vector<8x1xf32> -> vector<8x1xf32>
    %68 = vector.broadcast %67 : vector<8x1xf32> to vector<8x32xf32>
    %69 = arith.mulf %66, %68 : vector<8x32xf32>
    %70 = tpu.concatenate %21, %37, %53, %69 in 1 : vector<8x32xf32>, vector<8x32xf32>, vector<8x32xf32>, vector<8x32xf32> -> vector<8x128xf32>
    %c0_21 = arith.constant 0 : index
    %c0_22 = arith.constant 0 : index
    %c0_23 = arith.constant 0 : index
    %71 = vector.load %arg4[%c0_21, %c0_22, %c0_23] : memref<2x8x128xf32, #tpu.memory_space<vmem>>, vector<1x8x128xf32>
    %72 = vector.shape_cast %71 : vector<1x8x128xf32> to vector<8x128xf32>
    %73 = vector.shape_cast %70 : vector<8x128xf32> to vector<1x8x128xf32>
    tpu.vector_store %arg4[%c0_21, %c0_22, %c0_23], %73 {strides = array<i32>} : memref<2x8x128xf32, #tpu.memory_space<vmem>>, vector<1x8x128xf32>,
    %74 = vector.extract_strided_slice %5 {offsets = [8, 0], sizes = [8, 32], strides = [1, 1]} : vector<16x384xbf16> to vector<8x32xbf16>
    %75 = vector.extract_strided_slice %5 {offsets = [8, 128], sizes = [8, 32], strides = [1, 1]} : vector<16x384xbf16> to vector<8x32xbf16>
    %76 = vector.extract_strided_slice %5 {offsets = [8, 256], sizes = [8, 32], strides = [1, 1]} : vector<16x384xbf16> to vector<8x32xbf16>
    %cst_24 = arith.constant dense<0.000000e+00> : vector<8x8xf32>
    %77 = tpu.matmul %74, %75, %cst_24 {dimension_numbers = #tpu.dot_dimension_numbers<[1], [1], [0], [0], [0, 0, 1, 0], [], []>} : vector<8x32xbf16>, vector<8x32xbf16>, vector<8x8xf32> -> vector<8x8xf32>
    %cst_25 = arith.constant dense<0xFF800000> : vector<8xf32>
    %78 = vector.multi_reduction <maximumf>, %77, %cst_25 [1] : vector<8x8xf32> to vector<8xf32>
    %79 = vector.shape_cast %78 : vector<8xf32> to vector<8x1xf32>
    %80 = vector.broadcast %79 : vector<8x1xf32> to vector<8x8xf32>
    %81 = arith.subf %77, %80 : vector<8x8xf32>
    %82 = math.exp %81 : vector<8x8xf32>
    %cst_26 = arith.constant dense<0.000000e+00> : vector<8xf32>
    %83 = vector.multi_reduction <add>, %82, %cst_26 [1] : vector<8x8xf32> to vector<8xf32>
    %84 = vector.shape_cast %83 : vector<8xf32> to vector<8x1xf32>
    %85 = arith.truncf %82 : vector<8x8xf32> to vector<8x8xbf16>
    %cst_27 = arith.constant dense<0.000000e+00> : vector<8x32xf32>
    %86 = tpu.matmul %85, %76, %cst_27 {dimension_numbers = #tpu.dot_dimension_numbers<[1], [0], [0], [1], [0, 0, 1, 1], [], []>} : vector<8x8xbf16>, vector<8x32xbf16>, vector<8x32xf32> -> vector<8x32xf32>
    %87 = tpu.reciprocal %84 {approx = true} : vector<8x1xf32> -> vector<8x1xf32>
    %88 = vector.broadcast %87 : vector<8x1xf32> to vector<8x32xf32>
    %89 = arith.mulf %86, %88 : vector<8x32xf32>
    %90 = vector.extract_strided_slice %5 {offsets = [8, 32], sizes = [8, 32], strides = [1, 1]} : vector<16x384xbf16> to vector<8x32xbf16>
    %91 = vector.extract_strided_slice %5 {offsets = [8, 160], sizes = [8, 32], strides = [1, 1]} : vector<16x384xbf16> to vector<8x32xbf16>
    %92 = vector.extract_strided_slice %5 {offsets = [8, 288], sizes = [8, 32], strides = [1, 1]} : vector<16x384xbf16> to vector<8x32xbf16>
    %cst_28 = arith.constant dense<0.000000e+00> : vector<8x8xf32>
    %93 = tpu.matmul %90, %91, %cst_28 {dimension_numbers = #tpu.dot_dimension_numbers<[1], [1], [0], [0], [0, 0, 1, 0], [], []>} : vector<8x32xbf16>, vector<8x32xbf16>, vector<8x8xf32> -> vector<8x8xf32>
    %cst_29 = arith.constant dense<0xFF800000> : vector<8xf32>
    %94 = vector.multi_reduction <maximumf>, %93, %cst_29 [1] : vector<8x8xf32> to vector<8xf32>
    %95 = vector.shape_cast %94 : vector<8xf32> to vector<8x1xf32>
    %96 = vector.broadcast %95 : vector<8x1xf32> to vector<8x8xf32>
    %97 = arith.subf %93, %96 : vector<8x8xf32>
    %98 = math.exp %97 : vector<8x8xf32>
    %cst_30 = arith.constant dense<0.000000e+00> : vector<8xf32>
    %99 = vector.multi_reduction <add>, %98, %cst_30 [1] : vector<8x8xf32> to vector<8xf32>
    %100 = vector.shape_cast %99 : vector<8xf32> to vector<8x1xf32>
    %101 = arith.truncf %98 : vector<8x8xf32> to vector<8x8xbf16>
    %cst_31 = arith.constant dense<0.000000e+00> : vector<8x32xf32>
    %102 = tpu.matmul %101, %92, %cst_31 {dimension_numbers = #tpu.dot_dimension_numbers<[1], [0], [0], [1], [0, 0, 1, 1], [], []>} : vector<8x8xbf16>, vector<8x32xbf16>, vector<8x32xf32> -> vector<8x32xf32>
    %103 = tpu.reciprocal %100 {approx = true} : vector<8x1xf32> -> vector<8x1xf32>
    %104 = vector.broadcast %103 : vector<8x1xf32> to vector<8x32xf32>
    %105 = arith.mulf %102, %104 : vector<8x32xf32>
    %106 = vector.extract_strided_slice %5 {offsets = [8, 64], sizes = [8, 32], strides = [1, 1]} : vector<16x384xbf16> to vector<8x32xbf16>
    %107 = vector.extract_strided_slice %5 {offsets = [8, 192], sizes = [8, 32], strides = [1, 1]} : vector<16x384xbf16> to vector<8x32xbf16>
    %108 = vector.extract_strided_slice %5 {offsets = [8, 320], sizes = [8, 32], strides = [1, 1]} : vector<16x384xbf16> to vector<8x32xbf16>
    %cst_32 = arith.constant dense<0.000000e+00> : vector<8x8xf32>
    %109 = tpu.matmul %106, %107, %cst_32 {dimension_numbers = #tpu.dot_dimension_numbers<[1], [1], [0], [0], [0, 0, 1, 0], [], []>} : vector<8x32xbf16>, vector<8x32xbf16>, vector<8x8xf32> -> vector<8x8xf32>
    %cst_33 = arith.constant dense<0xFF800000> : vector<8xf32>
    %110 = vector.multi_reduction <maximumf>, %109, %cst_33 [1] : vector<8x8xf32> to vector<8xf32>
    %111 = vector.shape_cast %110 : vector<8xf32> to vector<8x1xf32>
    %112 = vector.broadcast %111 : vector<8x1xf32> to vector<8x8xf32>
    %113 = arith.subf %109, %112 : vector<8x8xf32>
    %114 = math.exp %113 : vector<8x8xf32>
    %cst_34 = arith.constant dense<0.000000e+00> : vector<8xf32>
    %115 = vector.multi_reduction <add>, %114, %cst_34 [1] : vector<8x8xf32> to vector<8xf32>
    %116 = vector.shape_cast %115 : vector<8xf32> to vector<8x1xf32>
    %117 = arith.truncf %114 : vector<8x8xf32> to vector<8x8xbf16>
    %cst_35 = arith.constant dense<0.000000e+00> : vector<8x32xf32>
    %118 = tpu.matmul %117, %108, %cst_35 {dimension_numbers = #tpu.dot_dimension_numbers<[1], [0], [0], [1], [0, 0, 1, 1], [], []>} : vector<8x8xbf16>, vector<8x32xbf16>, vector<8x32xf32> -> vector<8x32xf32>
    %119 = tpu.reciprocal %116 {approx = true} : vector<8x1xf32> -> vector<8x1xf32>
    %120 = vector.broadcast %119 : vector<8x1xf32> to vector<8x32xf32>
    %121 = arith.mulf %118, %120 : vector<8x32xf32>
    %122 = vector.extract_strided_slice %5 {offsets = [8, 96], sizes = [8, 32], strides = [1, 1]} : vector<16x384xbf16> to vector<8x32xbf16>
    %123 = vector.extract_strided_slice %5 {offsets = [8, 224], sizes = [8, 32], strides = [1, 1]} : vector<16x384xbf16> to vector<8x32xbf16>
    %124 = vector.extract_strided_slice %5 {offsets = [8, 352], sizes = [8, 32], strides = [1, 1]} : vector<16x384xbf16> to vector<8x32xbf16>
    %cst_36 = arith.constant dense<0.000000e+00> : vector<8x8xf32>
    %125 = tpu.matmul %122, %123, %cst_36 {dimension_numbers = #tpu.dot_dimension_numbers<[1], [1], [0], [0], [0, 0, 1, 0], [], []>} : vector<8x32xbf16>, vector<8x32xbf16>, vector<8x8xf32> -> vector<8x8xf32>
    %cst_37 = arith.constant dense<0xFF800000> : vector<8xf32>
    %126 = vector.multi_reduction <maximumf>, %125, %cst_37 [1] : vector<8x8xf32> to vector<8xf32>
    %127 = vector.shape_cast %126 : vector<8xf32> to vector<8x1xf32>
    %128 = vector.broadcast %127 : vector<8x1xf32> to vector<8x8xf32>
    %129 = arith.subf %125, %128 : vector<8x8xf32>
    %130 = math.exp %129 : vector<8x8xf32>
    %cst_38 = arith.constant dense<0.000000e+00> : vector<8xf32>
    %131 = vector.multi_reduction <add>, %130, %cst_38 [1] : vector<8x8xf32> to vector<8xf32>
    %132 = vector.shape_cast %131 : vector<8xf32> to vector<8x1xf32>
    %133 = arith.truncf %130 : vector<8x8xf32> to vector<8x8xbf16>
    %cst_39 = arith.constant dense<0.000000e+00> : vector<8x32xf32>
    %134 = tpu.matmul %133, %124, %cst_39 {dimension_numbers = #tpu.dot_dimension_numbers<[1], [0], [0], [1], [0, 0, 1, 1], [], []>} : vector<8x8xbf16>, vector<8x32xbf16>, vector<8x32xf32> -> vector<8x32xf32>
    %135 = tpu.reciprocal %132 {approx = true} : vector<8x1xf32> -> vector<8x1xf32>
    %136 = vector.broadcast %135 : vector<8x1xf32> to vector<8x32xf32>
    %137 = arith.mulf %134, %136 : vector<8x32xf32>
    %138 = tpu.concatenate %89, %105, %121, %137 in 1 : vector<8x32xf32>, vector<8x32xf32>, vector<8x32xf32>, vector<8x32xf32> -> vector<8x128xf32>
    %c1 = arith.constant 1 : index
    %c0_40 = arith.constant 0 : index
    %c0_41 = arith.constant 0 : index
    %139 = vector.load %arg4[%c1, %c0_40, %c0_41] : memref<2x8x128xf32, #tpu.memory_space<vmem>>, vector<1x8x128xf32>
    %140 = vector.shape_cast %139 : vector<1x8x128xf32> to vector<8x128xf32>
    %141 = vector.shape_cast %138 : vector<8x128xf32> to vector<1x8x128xf32>
    tpu.vector_store %arg4[%c1, %c0_40, %c0_41], %141 {strides = array<i32>} : memref<2x8x128xf32, #tpu.memory_space<vmem>>, vector<1x8x128xf32>,
    return
  }
  func.func @transform_0(%arg0: i32, %arg1: i32) -> (i32, i32, i32) {
    %c0_i32 = arith.constant 0 : i32
    %c0_i32_0 = arith.constant 0 : i32
    %c0_i32_1 = arith.constant 0 : i32
    return %arg1, %c0_i32, %c0_i32_0 : i32, i32, i32
  }
  func.func @transform_1(%arg0: i32, %arg1: i32) -> (i32, i32, i32) {
    %c0_i32 = arith.constant 0 : i32
    %c0_i32_0 = arith.constant 0 : i32
    %c0_i32_1 = arith.constant 0 : i32
    return %arg0, %c0_i32, %c0_i32_0 : i32, i32, i32
  }
  func.func @transform_2(%arg0: i32, %arg1: i32) -> (i32, i32, i32) {
    %c0_i32 = arith.constant 0 : i32
    %c0_i32_0 = arith.constant 0 : i32
    return %arg1, %c0_i32, %arg0 : i32, i32, i32
  }
}

</mosaic_0001>

<bundles_post_ra>
// kernel: tpu_custom_call.1
= control target key start
LH: loop header
LB: loop body
LE: loop exit
PB: predicated region body
PF: predicated region fallthrough
CT: control target
= control target key end

     0   :  { %7 = vsyncpa [#allocation3], 0  ;;  %s2182_s0 = inlined_call_operand.hbm [shape: bf16[2,8,32], index: 0, kind: input, shape index: {}]   ;;  %s2183_s1 = inlined_call_operand.hbm [shape: bf16[2,32,384], index: 1, kind: input, shape index: {}]   ;;  %s2184_s2 = inlined_call_operand.hbm [shape: f32[2,8,256], index: 2, kind: output, shape index: {}]  }
   0x1   :  { %8 = vsyncpa [#allocation6], 0 }
   0x2   :  { %10 = vsyncpa [#allocation6 + $0x1], 0 }
   0x3   :  { %11 = vsyncpa [#allocation4], 0 }
   0x4   :  { %13 = vsyncpa [#allocation4 + $0x1], 0  ;;  %s1843_s9 = smov 0   ;;  %s1845_s10 = smov 0  }
   0x5   :  { %s1847_s11 = smov 0   ;;  %s1849_s12 = smov 0  }
   0x6   :  { %s1851_s13 = smov 0   ;;  %s1853_s14 = smov 0  }
   0x7 LB: > { %s1364_s15 = sadd.s32 4294967295, %s1810_s14   ;;  %s1365_s16 = sadd.s32 4294967294, %s1810_s14   ;;  %s1810_s14 = sphi %s1853_s14, %s19_s14   ;;  %s1806_s13 = sphi %s1851_s13, %s2200_s13   ;;  %s1802_s12 = sphi %s1849_s12, %s2199_s12   ;;  %s1798_s11 = sphi %s1847_s11, %s2198_s11   ;;  %s1794_s10 = sphi %s1845_s10, %s2197_s10   ;;  %s1790_s9 = sphi %s1843_s9, %s2196_s9  }
   0x8   : > { %p77_p0 = scmp.ne.s32.totalorder %s1794_s10, %s1790_s9  ;;  %p1877_p1 = scmp.eq.s32.totalorder %s1364_s15, 0 }
   0x9   : > { %p1881_p2 = scmp.eq.s32.totalorder %s1364_s15, 1  ;;  %p109_p3 = scmp.eq.s32.totalorder %s1365_s16, 1 }
   0xa   : > { %p1887_p4 = por %p1877_p1, %p77_p0  ;;  %p1366_p5 = scmp.ge.s32.totalorder %s1810_s14, 1 }
   0xb   : > { %p1892_p6 = por %p109_p3, %p77_p0  ;;  %p116_p7 = scmp.lt.s32.totalorder %s1810_s14, 3 }
   0xc   : > { %s2188_s19 = scalar_select %p1887_p4, 1, 0 }
   0xd   : > { %s2189_s20 = scalar_select %p1892_p6, 1, 0 }
   0xe   : > { %p1897_p8 = pnand %p1366_p5, %p116_p7  ;;  %s1812_s22 = smov [#allocation2]  }
   0xf   : > { %s131_s23 = sshll.u32 %s1812_s22, 4  ;;  %p1368_p10 = scmp.ge.s32.totalorder %s1810_s14, 2  ;;  %s132_s23 = int_to_ptr.vmem [resolvable:$true] %s131_s23 }
  0x10   : > { %p1553_p9 = pneg %p1897_p8  ;;  %s31_s25 = sadd.s32 1, %s1806_s13 }
  0x11   : > { %s1683_s26 = scalar_lea.vmem %s132_s23, 128  ;;  %p1691_p5 = scmp.lt.s32.totalorder %s132_s23, %s132_s23 }
  0x12   : > { %p1906_p11 = pnand %p1553_p9, %p1877_p1  ;;  %p1684_p13 = scmp.ne.s32.totalorder %s132_s23, %s1683_s26 }
  0x13   : > { %p1692_p7 = scmp.lt.s32.totalorder %s1683_s26, %s1683_s26 }
  0x14   : > { %p1674_p12 = pneg %p1906_p11 }
  0x15   : > { %p1693_p6 = por %p1692_p7, %p1691_p5 }
  0x16   : > { %p1686_p0 = pnand %p1684_p13, %p1674_p12 }
  0x18   : > { %p1687_p3 = pneg %p1686_p0 }
  0x1a   : > { %p1694_p4 = pnand %p1693_p6, %p1687_p3 }
  0x1c   : > { %1697 = shalt.err (!%p1694_p4)
}
  0x1d   : > { %s1813_s27 = smov 64   ;;  %s1814_s28 = smov 4  }
  0x1e   : > { %1556 = dma.hbm_to_vmem [thread:$0]  (!%p1906_p11), %s2182_s0, 128, %s132_s23, [#allocation3], %s1813_s27, %s1813_s27, %s1814_s28  }
  0x1f   : > { %p33_p6 = scmp.ge.s32.totalorder %s31_s25, 2  ;;  %s64_s3 = sadd.s32 1, %s1798_s11 }
  0x20   : > { %p71_p4 = scmp.ne.s32.totalorder %s1798_s11, %s1794_s10  ;;  %p72_p9 = scmp.eq.s32.totalorder %s1810_s14, 0 }
  0x21   : > { %s2202_s25 = smov (%p33_p6, %s31_s25), 0  ;;  %p1566_p0 = scmp.lt.s32.totalorder %s1810_s14, 2 }
  0x22   : > { %p73_p12 = por %p72_p9, %p71_p4  ;;  %p1926_p13 = por %p1881_p2, %p71_p4 }
  0x23   : > { %s61_s5 = ssub.s32 %s1806_s13, %s2202_s25  ;;  %s145_s6 = sand.u32 1, %s1798_s11  }
  0x24   : > { %p62_p3 = scmp.eq.s32.totalorder %s61_s5, 0  ;;  %s1542_s7 = smul.u32 48, %s145_s6 }
  0x25   : > { %s1543_s15 = smul.u32 768, %s1806_s13  ;;  %p1938_p11 = pnand %p1566_p0, %p73_p12 }
  0x26   : > { %s1935_s8 = scalar_select %p62_p3, %s1798_s11, %s64_s3  }
  0x27   : > { %s149_s16 = scalar_lea.vmem [#allocation5], %s1542_s7  ;;  %s155_s26 = scalar_lea.hbm %s2183_s1, %s1543_s15 }
  0x28   : > { %s156_s22 = sshll.u32 %s149_s16, 4  ;;  %s146_s27 = scalar_lea.sflag [#allocation6], %s145_s6  ;;  %s157_s22 = int_to_ptr.vmem [resolvable:$true] %s156_s22 }
  0x29   : > { %p1700_p2 = pneg %p1938_p11  ;;  %s1711_s28 = scalar_lea.vmem %s157_s22, 768 }
  0x2a   : > { %p1712_p5 = scmp.ne.s32.totalorder %s157_s22, %s1711_s28  ;;  %s1815_s29 = smov [#allocation5]  }
  0x2b   : > { %s1716_s30 = sshll.u32 %s1815_s29, 4  ;;  %s1717_s30 = int_to_ptr.vmem [resolvable:$false] %s1716_s30 }
  0x2c   : > { %p1714_p7 = pnand %p1712_p5, %p1700_p2  ;;  %s1718_s3 = scalar_lea.vmem %s1717_s30, 1536 }
  0x2d   : > { %p1719_p4 = scmp.lt.s32.totalorder %s157_s22, %s1717_s30  ;;  %p1720_p9 = scmp.lt.s32.totalorder %s1718_s3, %s1711_s28 }
  0x2e   : > { %p1715_p6 = pneg %p1714_p7 }
  0x2f   : > { %p1721_p12 = por %p1720_p9, %p1719_p4 }
  0x31   : > { %p1722_p0 = pnand %p1721_p12, %p1715_p6 }
  0x33   : > { %1725 = shalt.err (!%p1722_p0)
}
  0x34   : > { %s1816_s5 = smov 192   ;;  %s1817_s7 = smov 12  }
  0x35   : > { %1560 = dma.hbm_to_vmem [thread:$0]  (!%p1938_p11), %s155_s26, 768, %s157_s22, %s146_s27, %s1816_s5, %s1816_s5, %s1817_s7  }
  0x36   : > { %168 = sbr.rel (%p1897_p8) target bundleno = 1157 (0x485), region = 28 }
  0x3b   : > { %1777 = dma.done.wait (%p1877_p1), [#allocation3], 128  }
  0x3c   : > { %1779 = vsyncadd (%p1877_p1), [#allocation3], 4294967168  ;;  %s1956_s6 = sand.u32 1, %s1794_s10   ;;  %p2194_p3 = scmp.ne.s32.totalorder %s2188_s19, 0 }
  0x3d   : > { %s1544_s15 = smul.u32 48, %s1956_s6  ;;  %s175_s16 = scalar_lea.sflag [#allocation6], %s1956_s6 }
  0x3f   : > { %s178_s24 = scalar_lea.vmem [#allocation5], %s1544_s15 }
  0x40   : > { %1781 = dma.done.wait (%p2194_p3), %s175_s16, 768  }
  0x41   : > { %1783 = vsyncadd (%p2194_p3), %s175_s16, 4294966528  ;;  %v1818_v0 = vmov 0   ;;  %v1631_v1 = vld [vmem:[%s178_s24 + $0x1c] ss:$12 sps:$4 sm:$0xff]   ;;  %v1633_v2 = vld [vmem:[%s178_s24 + $0x18] ss:$12 sps:$4 sm:$0xff]  }
  0x42   : > { %285 = vmatprep.mubr.bf16.mxu0 %v1818_v0  ;;  %265 = vmatprep.subr.bf16.mxu0 %v1631_v1  ;;  %v1634_v3 = vld [vmem:[%s178_s24 + $0x4] ss:$12 sps:$4 sm:$0xff]   ;;  %v1636_v4 = vld [vmem:[%s178_s24] ss:$12 sps:$4 sm:$0xff]   ;;  %vm249_vm0 = vcmask 261120   ;;  %v1819_v6 = vmov 0.0  }
  0x43   : > { %266 = vmatpush1.bf16.msra.mxu0 %v1633_v2  ;;  %v1637_v5 = vld [vmem:[#allocation2] sm:$0xff]   ;;  %1438 = vmatprep.subr.bf16.mxu1 %v1819_v6  ;;  %vm1820_vm1 = vmmov 0   ;;  %s1821_s17 = smov 64   ;;  %s1822_s19 = smov 96   ;;  %vm386_vm2 = vcmask 64512   ;;  %vm400_vm3 = vcmask 1043456  }
  0x44   : > { %267 = vmatprep.subr.bf16.mxu0 %v1634_v3  ;;  %1442 = vmatprep.mubr.msk.bf16.mxu1 %vm1820_vm1, %v1819_v6  ;;  %v1638_v9 = vld [vmem:[%s178_s24 + $0x20] ss:$12 sps:$4 sm:$0xff]   ;;  %v1639_v12 = vld [vmem:[%s178_s24 + $0x8] ss:$12 sps:$4 sm:$0xff]   ;;  %s1823_s21 = smov 32   ;;  %s1372_s22 = sshll.u32 %s1956_s6, 4 }
  0x45   : > { %1439 = vmatpush3.bf16.msra.mxu1 %v1638_v9  ;;  %vm792_vm4 = vcmask 523264   ;;  %vm794_vm5 = vcmask 785408   ;;  %s198_s23 = scalar_lea.vmem [#allocation7], %s1372_s22  ;;  %s1400_s26 = sshll.u32 %s1802_s12, 7 }
  0x46   : > { %1440 = vmatprep.subr.bf16.mxu1 %v1819_v6  ;;  %s1267_s18 = sshll.u32 %s198_s23, 4  ;;  %s2132_s29 = scalar_lea.hbm %s2184_s2, %s1400_s26  ;;  %s2126_s18 = int_to_ptr.vmem [resolvable:$true] %s1267_s18 }
  0x47   : > { %268 = vmatpush1.bf16.msra.mxu0 %v1636_v4  ;;  %s1252_s12 = scalar_lea.sflag [#allocation4], %s1956_s6  ;;  %s1726_s30 = scalar_lea.vmem %s2126_s18, 256 }
  0x48   : > { %1446 = vmatprep.subr.bf16.mxu0 %v1819_v6  ;;  %p1727_p1 = scmp.ne.s32.totalorder %s2126_s18, %s1726_s30  ;;  %s1824_s3 = smov [#allocation7]  }
  0x49   : > { %1441 = vmatpush3.bf16.msra.mxu1 %v1639_v12  ;;  %s1730_s5 = sshll.u32 %s1824_s3, 4  ;;  %s1731_s5 = int_to_ptr.vmem [resolvable:$false] %s1730_s5 }
  0x4a   : > { %1380 = vmatmul.mubr.msk.bf16.vlgmr.msra.gmra.mxu0 %vm249_vm0, %v1637_v5  ;;  %1452 = vmatprep.subr.bf16.mxu1 %v1819_v6  ;;  %p1728_p8 = pnand %p1727_p1, %p1926_p13  ;;  %s1732_s7 = scalar_lea.vmem %s1731_s5, 512 }
  0x4b   : > { %1448 = vmatprep.mubr.msk.bf16.mxu0 %vm1820_vm1, %v1819_v6  ;;  %p1733_p2 = scmp.lt.s32.totalorder %s2126_s18, %s1731_s5  ;;  %p1734_p5 = scmp.lt.s32.totalorder %s1732_s7, %s1726_s30 }
  0x4c   : > { %1443 = vmatmul.mubr.msk.bf16.vlgmr.msra.gmra.mxu1 %vm249_vm0, %v1637_v5  ;;  %p1729_p11 = pneg %p1728_p8 }
  0x4d   : > { %1454 = vmatprep.mubr.msk.bf16.mxu1 %vm1820_vm1, %v1819_v6  ;;  %p1735_p7 = por %p1734_p5, %p1733_p2 }
  0x4f   : > { %p1736_p6 = pnand %p1735_p7, %p1729_p11 }
 0x10a   : > { %v287_v7 = vpop.f32.mrf.mxu0 }
 0x10c   : > { %v289_v8 = vpop.f32.mrf.mxu0  ;;  %v330_v37 = vpop.f32.mrf.mxu1 }
 0x10e   : > { %v291_v10 = vpop.f32.mrf.mxu0  ;;  %v1444_v38 = vpop.f32.mrf.mxu1 }
 0x10f   : > { %v337_v15 = vpack.c.bf16 %v291_v10, %v287_v7 }
 0x110   : > { %v293_v11 = vpop.f32.mrf.mxu0  ;;  %v333_v39 = vpop.f32.mrf.mxu1 }
 0x111   : > { %v338_v13 = vpack.c.bf16 %v293_v11, %v289_v8  ;;  %v797_v16 = vrot.slane %v337_v15, 4  ;;  %v2025_v40 = vpack.c.bf16 %v333_v39, %v330_v37 }
 0x112   : > { %v1445_v41 = vpop.f32.mrf.mxu1 }
 0x113   : > { %561 = vrot.lane.b32.xlu1 %v338_v13, %s1821_s17  ;;  %450 = vrot.lane.b32.xlu0 %v338_v13, %s1822_s19  ;;  %v344_v14 = vsel %vm249_vm0, %v338_v13, 0  ;;  %v798_v17 = vrot.slane %v338_v13, 4  ;;  %v402_v45 = vsel %vm400_vm3, %v2025_v40, 0 }
 0x114   : > { %1447 = vmatpush3.bf16.xpose.msra.mxu0 %v344_v14  ;;  %1453 = vmatpush3.bf16.msra.mxu1 %v402_v45 }
 0x115   : > { %1458 = vmatprep.subr.bf16.mxu0 %v1819_v6  ;;  %v803_v27 = vsel %vm249_vm0, %v798_v17, 0  ;;  %1464 = vmatprep.subr.bf16.mxu1 %v1819_v6 }
 0x117   : > { %559 = vrot.lane.b32.xlu1 %v337_v15, %s1821_s17  ;;  %447 = vrot.lane.b32.xlu0 %v337_v15, %s1822_s19 }
 0x11b   : > { %669 = vrot.lane.b32.xlu1 %v337_v15, %s1823_s21  ;;  %671 = vrot.lane.b32.xlu0 %v338_v13, %s1823_s21 }
 0x11c   : > { %1449 = vmatmul.mubr.msk.bf16.vlgmr.msra.gmra.mxu0 %vm249_vm0, %v337_v15 }
 0x11d   : > { %1460 = vmatprep.mubr.msk.bf16.mxu0 %vm1820_vm1, %v1819_v6 }
 0x11f   : > { %904 = vrot.lane.b32.xlu1 %v797_v16, %s1822_s19  ;;  %906 = vrot.lane.b32.xlu0 %v798_v17, %s1822_s19 }
 0x123   : > { %1014 = vrot.lane.b32.xlu1 %v797_v16, %s1821_s17  ;;  %1016 = vrot.lane.b32.xlu0 %v798_v17, %s1821_s17 }
 0x127   : > { %1124 = vrot.lane.b32.xlu1 %v797_v16, %s1823_s21  ;;  %1126 = vrot.lane.b32.xlu0 %v798_v17, %s1823_s21 }
 0x185   : > { %v451_v18 = vpop.permute.xlu0 %450  ;;  %v562_v20 = vpop.permute.xlu1 %561 }
 0x186   : > { %v456_v19 = vsel %vm249_vm0, %v451_v18, 0  ;;  %v567_v22 = vsel %vm249_vm0, %v562_v20, 0 }
 0x187   : > { %1459 = vmatpush3.bf16.xpose.msra.mxu0 %v456_v19 }
 0x188   : > { %1470 = vmatprep.subr.bf16.mxu0 %v1819_v6 }
 0x189   : > { %v448_v21 = vpop.permute.xlu0 %447  ;;  %v560_v24 = vpop.permute.xlu1 %559 }
 0x18d   : > { %v672_v23 = vpop.permute.xlu0 %671  ;;  %v670_v26 = vpop.permute.xlu1 %669 }
 0x18e   : > { %1461 = vmatmul.mubr.msk.bf16.vlgmr.msra.gmra.mxu0 %vm249_vm0, %v448_v21  ;;  %v677_v25 = vsel %vm249_vm0, %v672_v23, 0 }
 0x18f   : > { %1471 = vmatpush3.bf16.xpose.msra.mxu0 %v567_v22  ;;  %1472 = vmatprep.mubr.msk.bf16.mxu0 %vm1820_vm1, %v1819_v6 }
 0x190   : > { %1482 = vmatprep.subr.bf16.mxu0 %v1819_v6 }
 0x191   : > { %v907_v28 = vpop.permute.xlu0 %906  ;;  %v905_v31 = vpop.permute.xlu1 %904 }
 0x192   : > { %v912_v29 = vsel %vm249_vm0, %v907_v28, 0 }
 0x195   : > { %v1017_v30 = vpop.permute.xlu0 %1016  ;;  %v1015_v34 = vpop.permute.xlu1 %1014 }
 0x196   : > { %1473 = vmatmul.mubr.msk.bf16.vlgmr.msra.gmra.mxu0 %vm249_vm0, %v560_v24  ;;  %v1022_v32 = vsel %vm249_vm0, %v1017_v30, 0 }
 0x197   : > { %1483 = vmatpush3.bf16.xpose.msra.mxu0 %v677_v25  ;;  %1484 = vmatprep.mubr.msk.bf16.mxu0 %vm1820_vm1, %v1819_v6  ;;  %v855_v25 = vrot.slane %v2025_v40, 4 }
 0x198   : > { %1494 = vmatprep.subr.bf16.mxu0 %v1819_v6 }
 0x199   : > { %v1127_v33 = vpop.permute.xlu0 %1126  ;;  %v1125_v36 = vpop.permute.xlu1 %1124 }
 0x19a   : > { %v1132_v35 = vsel %vm249_vm0, %v1127_v33, 0 }
 0x19e   : > { %1485 = vmatmul.mubr.msk.bf16.vlgmr.msra.gmra.mxu0 %vm249_vm0, %v670_v26 }
 0x19f   : > { %1495 = vmatpush3.bf16.xpose.msra.mxu0 %v803_v27  ;;  %1496 = vmatprep.mubr.msk.bf16.mxu0 %vm1820_vm1, %v1819_v6 }
 0x1a0   : > { %1506 = vmatprep.subr.bf16.mxu0 %v1819_v6 }
 0x1a6   : > { %1497 = vmatmul.mubr.msk.bf16.vlgmr.msra.gmra.mxu0 %vm249_vm0, %v797_v16 }
 0x1a7   : > { %1507 = vmatpush3.bf16.xpose.msra.mxu0 %v912_v29  ;;  %1508 = vmatprep.mubr.msk.bf16.mxu0 %vm1820_vm1, %v1819_v6 }
 0x1a8   : > { %1518 = vmatprep.subr.bf16.mxu0 %v1819_v6 }
 0x1ae   : > { %1509 = vmatmul.mubr.msk.bf16.vlgmr.msra.gmra.mxu0 %vm249_vm0, %v905_v31 }
 0x1af   : > { %1519 = vmatpush3.bf16.xpose.msra.mxu0 %v1022_v32  ;;  %1520 = vmatprep.mubr.msk.bf16.mxu0 %vm1820_vm1, %v1819_v6 }
 0x1b0   : > { %1530 = vmatprep.subr.bf16.mxu0 %v1819_v6 }
 0x1b6   : > { %1521 = vmatmul.mubr.msk.bf16.vlgmr.msra.gmra.mxu0 %vm249_vm0, %v1015_v34 }
 0x1b7   : > { %1531 = vmatpush3.bf16.xpose.msra.mxu0 %v1132_v35  ;;  %1532 = vmatprep.mubr.msk.bf16.mxu0 %vm1820_vm1, %v1819_v6 }
 0x1be   : > { %1533 = vmatmul.mubr.msk.bf16.vlgmr.msra.gmra.mxu0 %vm249_vm0, %v1125_v36 }
 0x1dc   : > { %v380_v42 = vpop.f32.mrf.mxu0 }
 0x1dd   : > { %v387_v43 = vsel %vm386_vm2, %v380_v42, -inf }
 0x1de   : > { %388 = vmax.xlane.f32.xlu0 %v387_v43  ;;  %v1450_v44 = vpop.f32.mrf.mxu0 }
 0x1e0   : > { %v383_v46 = vpop.f32.mrf.mxu0 }
 0x1e2   : > { %v1451_v47 = vpop.f32.mrf.mxu0 }
 0x24e   : > { %v492_v48 = vpop.f32.mrf.mxu0 }
 0x24f   : > { %v498_v49 = vsel %vm386_vm2, %v492_v48, -inf }
 0x250   : > { %499 = vmax.xlane.f32.xlu1 %v498_v49  ;;  %v1462_v50 = vpop.f32.mrf.mxu0  ;;  %v860_v49 = vsel %vm400_vm3, %v855_v25, 0 }
 0x252   : > { %v495_v51 = vpop.f32.mrf.mxu0 }
 0x254   : > { %v1463_v52 = vpop.f32.mrf.mxu0 }
 0x256   : > { %v603_v53 = vpop.f32.mrf.mxu0 }
 0x257   : > { %v609_v54 = vsel %vm386_vm2, %v603_v53, -inf }
 0x258   : > { %610 = vmax.xlane.f32.xlu0 %v609_v54  ;;  %v1474_v55 = vpop.f32.mrf.mxu0 }
 0x25a   : > { %v606_v56 = vpop.f32.mrf.mxu0 }
 0x25c   : > { %v1475_v57 = vpop.f32.mrf.mxu0 }
 0x25e   : > { %v713_v58 = vpop.f32.mrf.mxu0 }
 0x25f   : > { %v719_v59 = vsel %vm386_vm2, %v713_v58, -inf }
 0x260   : > { %720 = vmax.xlane.f32.xlu0 %v719_v59  ;;  %v1486_v60 = vpop.f32.mrf.mxu0 }
 0x261   : > { %619 = vrot.lane.b32.xlu1 %v2025_v40, %s1821_s17 }
 0x262   : > { %v716_v61 = vpop.f32.mrf.mxu0 }
 0x264   : > { %v1487_v62 = vpop.f32.mrf.mxu0 }
 0x265   : > { %729 = vrot.lane.b32.xlu1 %v2025_v40, %s1823_s21 }
 0x266   : > { %v2038_v63 = vpop.f32.mrf.mxu0 }
 0x267   : > { %v389_v0 = vpop.xlane.xlu0 %388  ;;  %v845_v21 = vsel %vm386_vm2, %v2038_v63, -inf }
 0x268   : > { %v390_v1 = vsub.f32 %v380_v42, %v389_v0  ;;  %v1498_v2 = vpop.f32.mrf.mxu0 }
 0x26a   : > { %v391_v3 = vmul.f32 1.442695, %v390_v1  ;;  %v842_v4 = vpop.f32.mrf.mxu0 }
 0x26c   : > { %1640 = vpow2.f32 %v391_v3  ;;  %v1499_v5 = vpop.f32.mrf.mxu0 }
 0x26e   : > { %v2040_v7 = vpop.f32.mrf.mxu0 }
 0x26f   : > { %v954_v22 = vsel %vm386_vm2, %v2040_v7, -inf }
 0x270   : > { %v1510_v8 = vpop.f32.mrf.mxu0 }
 0x272   : > { %v951_v9 = vpop.f32.mrf.mxu0 }
 0x274   : > { %v1511_v10 = vpop.f32.mrf.mxu0 }
 0x276   : > { %509 = vrot.lane.b32.xlu0 %v2025_v40, %s1822_s19  ;;  %v2044_v11 = vpop.f32.mrf.mxu0 }
 0x277   : > { %v1064_v24 = vsel %vm386_vm2, %v2044_v11, -inf }
 0x278   : > { %v1522_v12 = vpop.f32.mrf.mxu0 }
 0x279   : > { %v2046_v13 = vpop.eup %1640 }
 0x27a   : > { %v1061_v14 = vpop.f32.mrf.mxu0  ;;  %v396_v15 = vpack.c.bf16 %v2046_v13, %v2046_v13 }
 0x27c   : > { %1455 = vmatmul.mubr.msk.bf16.vlgmr.msra.gmra.mxu1 %vm386_vm2, %v396_v15  ;;  %v1523_v16 = vpop.f32.mrf.mxu0 }
 0x27d   : > { %1466 = vmatprep.mubr.msk.bf16.mxu1 %vm1820_vm1, %v1819_v6 }
 0x27e   : > { %v2053_v17 = vpop.f32.mrf.mxu0 }
 0x27f   : > { %v1174_v23 = vsel %vm386_vm2, %v2053_v17, -inf }
 0x280   : > { %v1534_v18 = vpop.f32.mrf.mxu0 }
 0x282   : > { %v1171_v19 = vpop.f32.mrf.mxu0 }
 0x284   : > { %v1535_v20 = vpop.f32.mrf.mxu0 }
 0x289   : > { %846 = vmax.xlane.f32.xlu1 %v845_v21 }
 0x28d   : > { %955 = vmax.xlane.f32.xlu1 %v954_v22 }
 0x291   : > { %1175 = vmax.xlane.f32.xlu1 %v1174_v23 }
 0x295   : > { %1065 = vmax.xlane.f32.xlu0 %v1064_v24 }
 0x2a2   : > { %1074 = vrot.lane.b32.xlu1 %v855_v25, %s1821_s17 }
 0x2ab   : > { %964 = vrot.lane.b32.xlu0 %v855_v25, %s1822_s19 }
 0x2af   : > { %1184 = vrot.lane.b32.xlu0 %v855_v25, %s1823_s21 }
 0x2d9   : > { %v500_v26 = vpop.xlane.xlu1 %499 }
 0x2da   : > { %v501_v27 = vsub.f32 %v492_v48, %v500_v26 }
 0x2dc   : > { %v502_v28 = vmul.f32 1.442695, %v501_v27 }
 0x2dd   : > { %v620_v39 = vpop.permute.xlu1 %619 }
 0x2de   : > { %1642 = vpow2.f32 %v502_v28  ;;  %v625_v41 = vsel %vm400_vm3, %v620_v39, 0 }
 0x2e1   : > { %v611_v29 = vpop.xlane.xlu0 %610  ;;  %v730_v44 = vpop.permute.xlu1 %729 }
 0x2e2   : > { %v612_v30 = vsub.f32 %v603_v53, %v611_v29  ;;  %v735_v46 = vsel %vm400_vm3, %v730_v44, 0 }
 0x2e4   : > { %v613_v31 = vmul.f32 1.442695, %v612_v30 }
 0x2e6   : > { %1644 = vpow2.f32 %v613_v31 }
 0x2e9   : > { %v721_v32 = vpop.xlane.xlu0 %720 }
 0x2ea   : > { %v722_v33 = vsub.f32 %v713_v58, %v721_v32 }
 0x2eb   : > { %v1643_v34 = vpop.eup %1642 }
 0x2ec   : > { %v723_v35 = vmul.f32 1.442695, %v722_v33  ;;  %v504_v36 = vsel %vm386_vm2, %v1643_v34, 0.0  ;;  %v507_v40 = vpack.c.bf16 %v1643_v34, %v1643_v34 }
 0x2ed   : > { %v510_v37 = vpop.permute.xlu0 %509  ;;  %505 = vadd.xlane.f32.xlu0 %v504_v36 }
 0x2ee   : > { %v515_v38 = vsel %vm400_vm3, %v510_v37, 0  ;;  %1646 = vpow2.f32 %v723_v35 }
 0x2ef   : > { %1465 = vmatpush3.bf16.msra.mxu1 %v515_v38 }
 0x2f0   : > { %1476 = vmatprep.subr.bf16.mxu1 %v1819_v6 }
 0x2f2   : > { %1467 = vmatmul.mubr.msk.bf16.vlgmr.msra.gmra.mxu1 %vm386_vm2, %v507_v40 }
 0x2f3   : > { %v1645_v42 = vpop.eup %1644  ;;  %1477 = vmatpush3.bf16.msra.mxu1 %v625_v41  ;;  %1478 = vmatprep.mubr.msk.bf16.mxu1 %vm1820_vm1, %v1819_v6 }
 0x2f4   : > { %v615_v43 = vsel %vm386_vm2, %v1645_v42, 0.0  ;;  %1488 = vmatprep.subr.bf16.mxu1 %v1819_v6  ;;  %v618_v45 = vpack.c.bf16 %v1645_v42, %v1645_v42 }
 0x2f5   : > { %616 = vadd.xlane.f32.xlu0 %v615_v43 }
 0x2fa   : > { %1479 = vmatmul.mubr.msk.bf16.vlgmr.msra.gmra.mxu1 %vm386_vm2, %v618_v45 }
 0x2fb   : > { %1489 = vmatpush3.bf16.msra.mxu1 %v735_v46  ;;  %1490 = vmatprep.mubr.msk.bf16.mxu1 %vm1820_vm1, %v1819_v6  ;;  %v1647_v47 = vpop.eup %1646 }
 0x2fc   : > { %1500 = vmatprep.subr.bf16.mxu1 %v1819_v6  ;;  %v728_v48 = vpack.c.bf16 %v1647_v47, %v1647_v47  ;;  %v725_v5 = vsel %vm386_vm2, %v1647_v47, 0.0 }
 0x302   : > { %1491 = vmatmul.mubr.msk.bf16.vlgmr.msra.gmra.mxu1 %vm386_vm2, %v728_v48 }
 0x303   : > { %1501 = vmatpush3.bf16.msra.mxu1 %v860_v49  ;;  %1502 = vmatprep.mubr.msk.bf16.mxu1 %vm1820_vm1, %v1819_v6 }
 0x304   : > { %1512 = vmatprep.subr.bf16.mxu1 %v1819_v6 }
 0x312   : > { %v847_v50 = vpop.xlane.xlu1 %846 }
 0x313   : > { %v848_v51 = vsub.f32 %v2038_v63, %v847_v50 }
 0x315   : > { %v849_v52 = vmul.f32 1.442695, %v848_v51 }
 0x316   : > { %v956_v53 = vpop.xlane.xlu1 %955 }
 0x317   : > { %1648 = vpow2.f32 %v849_v52  ;;  %v957_v54 = vsub.f32 %v2040_v7, %v956_v53 }
 0x319   : > { %v958_v55 = vmul.f32 1.442695, %v957_v54 }
 0x31a   : > { %v1176_v56 = vpop.xlane.xlu1 %1175 }
 0x31b   : > { %1650 = vpow2.f32 %v958_v55  ;;  %v1177_v57 = vsub.f32 %v2053_v17, %v1176_v56 }
 0x31d   : > { %v1178_v60 = vmul.f32 1.442695, %v1177_v57 }
 0x31e   : > { %v1066_v58 = vpop.xlane.xlu0 %1065  ;;  %v1075_v4 = vpop.permute.xlu1 %1074 }
 0x31f   : > { %v1067_v59 = vsub.f32 %v2044_v11, %v1066_v58  ;;  %v1080_v8 = vsel %vm400_vm3, %v1075_v4, 0  ;;  %v393_v11 = vsel %vm386_vm2, %v2046_v13, 0.0 }
 0x321   : > { %v1068_v61 = vmul.f32 1.442695, %v1067_v59 }
 0x322   : > { %v965_v0 = vpop.permute.xlu0 %964 }
 0x323   : > { %1652 = vpow2.f32 %v1068_v61  ;;  %v970_v1 = vsel %vm400_vm3, %v965_v0, 0 }
 0x324   : > { %v1649_v62 = vpop.eup %1648  ;;  %1654 = vpow2.f32 %v1178_v60 }
 0x325   : > { %v854_v63 = vpack.c.bf16 %v1649_v62, %v1649_v62  ;;  %v851_v13 = vsel %vm386_vm2, %v1649_v62, 0.0 }
 0x326   : > { %v1185_v14 = vpop.permute.xlu0 %1184 }
 0x327   : > { %1503 = vmatmul.mubr.msk.bf16.vlgmr.msra.gmra.mxu1 %vm386_vm2, %v854_v63  ;;  %v1190_v17 = vsel %vm400_vm3, %v1185_v14, 0 }
 0x328   : > { %v1651_v2 = vpop.eup %1650  ;;  %1513 = vmatpush3.bf16.msra.mxu1 %v970_v1  ;;  %1514 = vmatprep.mubr.msk.bf16.mxu1 %vm1820_vm1, %v1819_v6 }
 0x329   : > { %v960_v3 = vsel %vm386_vm2, %v1651_v2, 0.0  ;;  %1524 = vmatprep.subr.bf16.mxu1 %v1819_v6  ;;  %v963_v7 = vpack.c.bf16 %v1651_v2, %v1651_v2 }
 0x32a   : > { %961 = vadd.xlane.f32.xlu1 %v960_v3 }
 0x32e   : > { %726 = vadd.xlane.f32.xlu1 %v725_v5 }
 0x32f   : > { %1515 = vmatmul.mubr.msk.bf16.vlgmr.msra.gmra.mxu1 %vm386_vm2, %v963_v7 }
 0x330   : > { %v1653_v9 = vpop.eup %1652  ;;  %1525 = vmatpush3.bf16.msra.mxu1 %v1080_v8  ;;  %1526 = vmatprep.mubr.msk.bf16.mxu1 %vm1820_vm1, %v1819_v6 }
 0x331   : > { %v1070_v10 = vsel %vm386_vm2, %v1653_v9, 0.0  ;;  %1536 = vmatprep.subr.bf16.mxu1 %v1819_v6  ;;  %v1655_v12 = vpop.eup %1654  ;;  %v1073_v16 = vpack.c.bf16 %v1653_v9, %v1653_v9 }
 0x332   : > { %1071 = vadd.xlane.f32.xlu0 %v1070_v10  ;;  %394 = vadd.xlane.f32.xlu1 %v393_v11  ;;  %v1180_v15 = vsel %vm386_vm2, %v1655_v12, 0.0  ;;  %v1183_v19 = vpack.c.bf16 %v1655_v12, %v1655_v12 }
 0x336   : > { %1181 = vadd.xlane.f32.xlu0 %v1180_v15 }
 0x337   : > { %1527 = vmatmul.mubr.msk.bf16.vlgmr.msra.gmra.mxu1 %vm386_vm2, %v1073_v16 }
 0x338   : > { %1537 = vmatpush3.bf16.msra.mxu1 %v1190_v17  ;;  %1538 = vmatprep.mubr.msk.bf16.mxu1 %vm1820_vm1, %v1819_v6 }
 0x33a   : > { %852 = vadd.xlane.f32.xlu0 %v851_v13 }
 0x33c   : > { %v2111_v18 = vpop.f32.mrf.mxu1 }
 0x33e   : > { %v1456_v20 = vpop.f32.mrf.mxu1 }
 0x33f   : > { %1539 = vmatmul.mubr.msk.bf16.vlgmr.msra.gmra.mxu1 %vm386_vm2, %v1183_v19 }
 0x340   : > { %v441_v21 = vpop.f32.mrf.mxu1 }
 0x342   : > { %v1457_v22 = vpop.f32.mrf.mxu1 }
 0x376   : > { %v506_v23 = vpop.xlane.xlu0 %505 }
 0x377   : > { %1656 = vrcp.f32 %v506_v23 }
 0x37e   : > { %v617_v24 = vpop.xlane.xlu0 %616 }
 0x37f   : > { %1658 = vrcp.f32 %v617_v24 }
 0x384   : > { %v1657_v25 = vpop.eup %1656 }
 0x38c   : > { %v1659_v32 = vpop.eup %1658 }
 0x3b2   : > { %v551_v26 = vpop.f32.mrf.mxu1 }
 0x3b3   : > { %v558_v27 = vmul.f32 %v1657_v25, %v551_v26  ;;  %v962_v28 = vpop.xlane.xlu1 %961 }
 0x3b4   : > { %v1468_v6 = vpop.f32.mrf.mxu1 }
 0x3b5   : > { %780 = vrot.lane.b32.xlu1 %v558_v27, %s1823_s21 }
 0x3b6   : > { %v554_v29 = vpop.f32.mrf.mxu1 }
 0x3b7   : > { %v727_v30 = vpop.xlane.xlu1 %726 }
 0x3b8   : > { %1660 = vrcp.f32 %v727_v30  ;;  %v1469_v31 = vpop.f32.mrf.mxu1 }
 0x3b9   : > { %1662 = vrcp.f32 %v962_v28 }
 0x3ba   : > { %v661_v33 = vpop.f32.mrf.mxu1 }
 0x3bb   : > { %v668_v34 = vmul.f32 %v1659_v32, %v661_v33  ;;  %v1072_v44 = vpop.xlane.xlu0 %1071  ;;  %v395_v4 = vpop.xlane.xlu1 %394 }
 0x3bc   : > { %v1480_v35 = vpop.f32.mrf.mxu1  ;;  %1664 = vrcp.f32 %v1072_v44 }
 0x3bd   : > { %784 = vrot.lane.b32.xlu0 %v668_v34, %s1821_s17 }
 0x3be   : > { %v664_v36 = vpop.f32.mrf.mxu1 }
 0x3bf   : > { %v1182_v50 = vpop.xlane.xlu0 %1181 }
 0x3c0   : > { %v1481_v37 = vpop.f32.mrf.mxu1  ;;  %1666 = vrcp.f32 %v1182_v50 }
 0x3c1   : > { %1668 = vrcp.f32 %v395_v4 }
 0x3c2   : > { %v771_v38 = vpop.f32.mrf.mxu1 }
 0x3c3   : > { %v853_v5 = vpop.xlane.xlu0 %852 }
 0x3c4   : > { %v1492_v39 = vpop.f32.mrf.mxu1  ;;  %1670 = vrcp.f32 %v853_v5 }
 0x3c5   : > { %v1661_v40 = vpop.eup %1660 }
 0x3c6   : > { %v778_v41 = vmul.f32 %v1661_v40, %v771_v38  ;;  %v774_v42 = vpop.f32.mrf.mxu1  ;;  %v1663_v49 = vpop.eup %1662 }
 0x3c8   : > { %v1493_v43 = vpop.f32.mrf.mxu1  ;;  %788 = vrot.lane.b32.xlu1 %v778_v41, %s1822_s19 }
 0x3c9   : > { %v1665_v56 = vpop.eup %1664 }
 0x3cd   : > { %v1667_v62 = vpop.eup %1666 }
 0x3ce   : > { %v1669_v7 = vpop.eup %1668 }
 0x3cf   : > { %v445_v9 = vmul.f32 %v1669_v7, %v2111_v18 }
 0x3d1   : > { %v1671_v16 = vpop.eup %1670 }
 0x3e7   : > { %v896_v45 = vpop.f32.mrf.mxu1 }
 0x3e8   : > { %v903_v13 = vmul.f32 %v1671_v16, %v896_v45 }
 0x3e9   : > { %v1504_v46 = vpop.f32.mrf.mxu1 }
 0x3eb   : > { %v899_v47 = vpop.f32.mrf.mxu1 }
 0x3ed   : > { %v1505_v48 = vpop.f32.mrf.mxu1 }
 0x3ef   : > { %v1006_v51 = vpop.f32.mrf.mxu1 }
 0x3f0   : > { %v1013_v52 = vmul.f32 %v1663_v49, %v1006_v51 }
 0x3f1   : > { %v1516_v53 = vpop.f32.mrf.mxu1 }
 0x3f2   : > { %1235 = vrot.lane.b32.xlu1 %v1013_v52, %s1823_s21 }
 0x3f3   : > { %v1009_v54 = vpop.f32.mrf.mxu1 }
 0x3f5   : > { %v1517_v55 = vpop.f32.mrf.mxu1 }
 0x3f7   : > { %v1116_v57 = vpop.f32.mrf.mxu1 }
 0x3f8   : > { %v1123_v58 = vmul.f32 %v1665_v56, %v1116_v57 }
 0x3f9   : > { %v1528_v59 = vpop.f32.mrf.mxu1 }
 0x3fa   : > { %1239 = vrot.lane.b32.xlu0 %v1123_v58, %s1821_s17 }
 0x3fb   : > { %v1119_v60 = vpop.f32.mrf.mxu1 }
 0x3fd   : > { %v1529_v61 = vpop.f32.mrf.mxu1 }
 0x3ff   : > { %v1226_v0 = vpop.f32.mrf.mxu1 }
 0x400   : > { %v1233_v63 = vmul.f32 %v1667_v62, %v1226_v0 }
 0x401   : > { %v1540_v1 = vpop.f32.mrf.mxu1 }
 0x402   : > { %1243 = vrot.lane.b32.xlu1 %v1233_v63, %s1822_s19 }
 0x403   : > { %v1229_v2 = vpop.f32.mrf.mxu1 }
 0x405   : > { %v1541_v3 = vpop.f32.mrf.mxu1 }
 0x427   : > { %v781_v8 = vpop.permute.xlu1 %780 }
 0x428   : > { %v791_v11 = vsel %vm249_vm0, %v445_v9, %v781_v8 }
 0x42f   : > { %v785_v10 = vpop.permute.xlu0 %784 }
 0x430   : > { %v793_v12 = vsel %vm792_vm4, %v791_v11, %v785_v10 }
 0x43a   : > { %v789_v14 = vpop.permute.xlu1 %788 }
 0x43b   : > { %v795_v15 = vsel %vm794_vm5, %v793_v12, %v789_v14 }
 0x43c   : > { %796 = vst [vmem:[%s198_s23] sm:$0xff] %v795_v15 }
 0x464   : > { %v1236_v17 = vpop.permute.xlu1 %1235 }
 0x465   : > { %v1246_v19 = vsel %vm249_vm0, %v903_v13, %v1236_v17 }
 0x46c   : > { %v1240_v18 = vpop.permute.xlu0 %1239 }
 0x46d   : > { %v1247_v20 = vsel %vm792_vm4, %v1246_v19, %v1240_v18 }
 0x474   : > { %v1244_v21 = vpop.permute.xlu1 %1243 }
 0x475   : > { %v1248_v22 = vsel %vm794_vm5, %v1247_v20, %v1244_v21 }
 0x476   : > { %1398 = vst [vmem:[%s198_s23 + $0x8] sm:$0xff] %v1248_v22 }
 0x477   : > { %1739 = shalt.err (!%p1736_p6)
}
 0x478   : > { %s1740_s15 = scalar_lea.hbm %s2132_s29, 256  ;;  %s1744_s17 = scalar_lea.hbm %s2184_s2, 512 }
 0x479   : > { %p1741_p4 = scmp.ne.s32.totalorder %s2132_s29, %s1740_s15  ;;  %p1745_p0 = scmp.lt.s32.totalorder %s2132_s29, %s2184_s2 }
 0x47a   : > { %p1746_p3 = scmp.lt.s32.totalorder %s1744_s17, %s1740_s15 }
 0x47b   : > { %p1742_p9 = pnand %p1741_p4, %p1926_p13 }
 0x47c   : > { %p1747_p1 = por %p1746_p3, %p1745_p0 }
 0x47d   : > { %p1743_p12 = pneg %p1742_p9 }
 0x47f   : > { %p1748_p8 = pnand %p1747_p1, %p1743_p12 }
 0x481   : > { %1751 = shalt.err (!%p1748_p8)
}
 0x482   : > { %s1825_s22 = smov 128   ;;  %s1826_s23 = smov 256  }
 0x483   : > { %s1827_s26 = smov 8  }
 0x484   : > { %1551 = dma.vmem_to_hbm [thread:$0]  (%p1926_p13), %s2126_s18, 256, %s2132_s29, %s1252_s12, %s1825_s22, %s1826_s23, %s1827_s26  }
 0x485 PF: > { %s1282_s27 = sand.u32 1, %s1790_s9   ;;  %p2195_p11 = scmp.ne.s32.totalorder %s2189_s20, 0 }
 0x486   : > { %s1283_s28 = scalar_lea.sflag [#allocation4], %s1282_s27 }
 0x487   : > { %p1562_p2 = pnand %p1368_p10, %p2195_p11 }
 0x489   : > { %p1563_p5 = pneg %p1562_p2 }
 0x48b   : > { %1785 = dma.done.wait (%p1563_p5), %s1283_s28, 256  }
 0x48c   : > { %1787 = vsyncadd (%p1563_p5), %s1283_s28, 4294967040  ;;  %s19_s14 = sadd.s32 1, %s1810_s14   ;;  %s2196_s9 = smov %s1794_s10 }
 0x48d   : > { %p16_p7 = scmp.ge.s32.totalorder %s19_s14, 4   ;;  %s2197_s10 = smov %s1798_s11 }
 0x48e   : > { %s2198_s11 = smov %s1935_s8  ;;  %s2199_s12 = smov %s1806_s13 }
 0x48f   : > { %s2200_s13 = smov %s2202_s25  ;;  %18 = sbr.rel (!%p16_p7) target bundleno = 7 (0x7), region = 80 }
 0x494   :  { %1288 = vsyncpa [#allocation3], 1 }
 0x495   :  { %1290 = vsyncpa [#allocation3 + $0x1], 1 }
 0x496   :  { %1291 = vsyncpa [#allocation6], 1 }
 0x497   :  { %1293 = vsyncpa [#allocation6 + $0x1], 1 }
 0x498   :  { %1294 = vsyncpa [#allocation4], 1 }
 0x499   :  { %1296 = vsyncpa [#allocation4 + $0x1], 1 }

</bundles_post_ra>
